<compile_context>
chip_gen: v7x
topology: tpu7x:2x2x1
jax: 0.10.0
libtpu: 0.0.40
codegen_flags: <defaults>
</compile_context>

<pallas_src>
import functools
import math

import numpy as np
import jax
import jax.numpy as jnp
from jax.experimental import pallas as pl
from jax.experimental.pallas import tpu as pltpu


def _bilinear_up_matrix(n: int) -> np.ndarray:
    """(2n, n) matrix for 2x bilinear upsampling, align_corners=False
    (matches nn.Upsample(scale_factor=2, mode='bilinear') default)."""
    m = 2 * n
    u = np.zeros((m, n), dtype=np.float32)
    for i in range(m):
        src = max((i + 0.5) / 2.0 - 0.5, 0.0)
        i0 = min(int(np.floor(src)), n - 1)
        frac = src - i0
        i1 = min(i0 + 1, n - 1)
        u[i, i0] += 1.0 - frac
        u[i, i1] += frac
    return u


def _padded_up_matrix(n_in: int, n_out: int, pad_before: int) -> np.ndarray:
    """(n_out, n_in) matrix = 2x bilinear upsample with F.pad folded in.

    pad_before >= 0 places the 2*n_in upsampled samples at that offset
    (zero rows elsewhere); pad_before < 0 crops, exactly like F.pad with
    negative pads."""
    u = _bilinear_up_matrix(n_in)                    # (2*n_in, n_in)
    m = np.zeros((n_out, n_in), dtype=np.float32)
    for i in range(n_out):
        s = i - pad_before
        if 0 <= s < 2 * n_in:
            m[i] = u[s]
    return m


def _channel_tile(c1: int, c2: int, per_channel_bytes: int,
                  budget_bytes: int) -> int:
    """Largest common divisor of (c1, c2) that fits the VMEM budget and keeps
    the in-kernel per-channel unroll bounded (<= 32)."""
    g = math.gcd(c1, c2)
    cap = max(1, min(budget_bytes // max(per_channel_bytes, 1), 32))
    ct = 1
    for d in range(1, g + 1):
        if g % d == 0 and d <= cap:
            ct = d
    return ct


def _up_concat_kernel(x1_ref, x2_ref, uh_ref, uwt_ref, out_ref, *,
                      nc2, ct, h1, w1):
    j = pl.program_id(1)

    @pl.when(j < nc2)
    def _copy_x2():
        # Pass-through tile of x2 -> out[:, :c2]; its DMAs overlap the
        # neighbouring upsample steps via the BlockSpec pipeline.
        out_ref[...] = x2_ref[...].astype(out_ref.dtype)

    @pl.when(j >= nc2)
    def _upsample_x1():
        x1 = x1_ref[0].astype(jnp.float32)                     # (ct, H1, W1)
        # W pass: one big (ct*H1, W1) @ (W1, w2) MXU matmul; padding/cropping
        # along W is already folded into uwt.
        xw = jnp.dot(x1.reshape(ct * h1, w1), uwt_ref[...],
                     preferred_element_type=jnp.float32)       # (ct*H1, w2)
        xw = xw.reshape(ct, h1, -1)                            # (ct, H1, w2)
        uh = uh_ref[...]                                       # (h2, H1)
        # H pass: bounded unroll (ct <= 32) of clean 2-D matmuls -- no
        # broadcast_to(uh, (ct, h2, H1)) materialization, no batched einsum,
        # and the result stays f32 until the single final store.
        for c in range(ct):
            up_c = jnp.dot(uh, xw[c], preferred_element_type=jnp.float32)
            out_ref[0, c] = up_c.astype(out_ref.dtype)


def up_forward(x1, x2, *, vmem_budget_bytes=24 << 20):
    n, c1, h1, w1 = x1.shape
    n2, c2, h2, w2 = x2.shape
    assert n == n2, "batch sizes must match"

    diff_y = h2 - 2 * h1
    diff_x = w2 - 2 * w1
    pad_top = diff_y // 2          # may be negative (crop), like F.pad
    pad_left = diff_x // 2

    # Interpolation matrices with the padding/cropping folded in (f32 so the
    # intermediate stays at f32 precision; the kernel is bandwidth-bound, so
    # the f32 MXU rate is irrelevant on the wall clock).
    uh_p = jnp.asarray(_padded_up_matrix(h1, h2, pad_top))       # (h2, H1)
    uwt_p = jnp.asarray(_padded_up_matrix(w1, w2, pad_left).T)   # (W1, w2)

    itemsize = jnp.dtype(x1.dtype).itemsize
    # Per-channel, per-step VMEM: double-buffered x1/x2/out blocks plus the
    # f32 intermediates of the upsample path.
    per_ch = 2 * itemsize * (h1 * w1 + 2 * h2 * w2) + 4 * (h1 * w2 + h2 * w2)
    ct = _channel_tile(c1, c2, per_ch, vmem_budget_bytes)
    nc1, nc2 = c1 // ct, c2 // ct

    est = ct * per_ch + 8 * (h2 * h1 + w1 * w2) + (4 << 20)
    try:
        cap = int(pltpu.get_tpu_info().vmem_capacity_bytes)
    except Exception:
        cap = 64 << 20
    vmem_limit = int(min(max(est, 32 << 20), 100 << 20, cap - (2 << 20)))

    kernel = functools.partial(_up_concat_kernel, nc2=nc2, ct=ct, h1=h1, w1=w1)

    return pl.pallas_call(
        kernel,
        out_shape=jax.ShapeDtypeStruct((n, c1 + c2, h2, w2), x1.dtype),
        grid_spec=pltpu.PrefetchScalarGridSpec(
            num_scalar_prefetch=0,
            grid=(n, nc2 + nc1),
            in_specs=[
                # x1: only used on upsample steps; clamped index so the block
                # index is unchanged on pass-through steps (no refetch).
                pl.BlockSpec((1, ct, h1, w1),
                             lambda b, j: (b, jnp.maximum(j - nc2, 0), 0, 0)),
                # x2: only used on pass-through steps; clamped likewise.
                pl.BlockSpec((1, ct, h2, w2),
                             lambda b, j: (b, jnp.minimum(j, nc2 - 1), 0, 0)),
                pl.BlockSpec((h2, h1), lambda b, j: (0, 0)),
                pl.BlockSpec((w1, w2), lambda b, j: (0, 0)),
            ],
            out_specs=pl.BlockSpec((1, ct, h2, w2), lambda b, j: (b, j, 0, 0)),
        ),
        compiler_params=pltpu.CompilerParams(
            # Every (batch, channel-tile) step is independent and writes its
            # own output block -> both axes parallel (dual-TC even at n=1).
            dimension_semantics=("parallel", "parallel"),
            vmem_limit_bytes=vmem_limit,
        ),
    )(x1, x2, uh_p, uwt_p)


if __name__ == "__main__":
    key = jax.random.PRNGKey(0)
    k1, k2, k3 = jax.random.split(key, 3)

    def reference(x1, x2):
        x1_np = np.asarray(x1, np.float32)
        x2_np = np.asarray(x2, np.float32)
        n, c1, h1, w1 = x1_np.shape
        h2, w2 = x2_np.shape[2], x2_np.shape[3]
        uh = _bilinear_up_matrix(h1)
        uw = _bilinear_up_matrix(w1)
        up = np.einsum("hH,ncHW,wW->nchw", uh, x1_np, uw)       # (n,c1,2H1,2W1)
        pt, pleft = (h2 - 2 * h1) // 2, (w2 - 2 * w1) // 2
        padded = np.zeros((n, c1, h2, w2), np.float32)
        dt, db = max(pt, 0), min(pt + 2 * h1, h2)
        dl, dr = max(pleft, 0), min(pleft + 2 * w1, w2)
        padded[:, :, dt:db, dl:dr] = up[:, :, dt - pt:db - pt,
                                        dl - pleft:dr - pleft]
        return np.concatenate([x2_np, padded], axis=1)

    # Case 1: symmetric positive padding (8 -> 16, padded to 18).
    x1 = jax.random.normal(k1, (2, 4, 8, 8), dtype=jnp.float32)
    x2 = jax.random.normal(k2, (2, 4, 18, 18), dtype=jnp.float32)
    out = jax.block_until_ready(up_forward(x1, x2))
    ref = reference(x1, x2)
    assert out.shape == ref.shape, (out.shape, ref.shape)
    np.testing.assert_allclose(np.asarray(out), ref, rtol=1e-5, atol=1e-5)

    # Case 2: asymmetric padding on H (16 -> 19: pad 1/2) and cropping on W
    # (16 -> 14: crop 1/1), i.e. F.pad with mixed positive/negative pads.
    x2b = jax.random.normal(k3, (2, 4, 19, 14), dtype=jnp.float32)
    outb = jax.block_until_ready(up_forward(x1, x2b))
    refb = reference(x1, x2b)
    assert outb.shape == refb.shape, (outb.shape, refb.shape)
    np.testing.assert_allclose(np.asarray(outb), refb, rtol=1e-5, atol=1e-5)

    print("KERNEL_OK")
</pallas_src>

<mosaic_0001>
module attributes {stable_mosaic.version = 11 : i64} {
  func.func @_up_concat_kernel(%arg0: i32, %arg1: i32, %arg2: memref<1x4x8x8xf32, #tpu.memory_space<vmem>>, %arg3: memref<1x4x18x18xf32, #tpu.memory_space<vmem>>, %arg4: memref<18x8xf32, #tpu.memory_space<vmem>>, %arg5: memref<8x18xf32, #tpu.memory_space<vmem>>, %arg6: memref<1x4x18x18xf32, #tpu.memory_space<vmem>>) attributes {dimension_semantics = [#tpu.dimension_semantics<parallel>, #tpu.dimension_semantics<parallel>], iteration_bounds = array<i64: 2, 2>, scalar_prefetch = 0 : i64, scratch_operands = 0 : i64, tpu.core_type = #tpu.core_type<tc>, window_params = [{transform_indices = @transform_0, window_bounds = array<i64: 1, 4, 8, 8>}, {transform_indices = @transform_1, window_bounds = array<i64: 1, 4, 18, 18>}, {pipeline_mode = #tpu.pipeline_mode<synchronous>, transform_indices = @transform_2, window_bounds = array<i64: 18, 8>}, {pipeline_mode = #tpu.pipeline_mode<synchronous>, transform_indices = @transform_3, window_bounds = array<i64: 8, 18>}, {transform_indices = @transform_4, window_bounds = array<i64: 1, 4, 18, 18>}]} {
    %c1_i32 = arith.constant 1 : i32
    %0 = arith.cmpi slt, %arg1, %c1_i32 : i32
    %1 = arith.extui %0 : i1 to i32
    %c0_i32 = arith.constant 0 : i32
    %2 = arith.cmpi ne, %1, %c0_i32 : i32
    scf.if %2 {
      %c0 = arith.constant 0 : index
      %c0_2 = arith.constant 0 : index
      %c0_3 = arith.constant 0 : index
      %c0_4 = arith.constant 0 : index
      %6 = vector.load %arg3[%c0, %c0_2, %c0_3, %c0_4] : memref<1x4x18x18xf32, #tpu.memory_space<vmem>>, vector<1x4x18x18xf32>
      %c0_5 = arith.constant 0 : index
      %c0_6 = arith.constant 0 : index
      %c0_7 = arith.constant 0 : index
      %c0_8 = arith.constant 0 : index
      %7 = vector.load %arg6[%c0_5, %c0_6, %c0_7, %c0_8] : memref<1x4x18x18xf32, #tpu.memory_space<vmem>>, vector<1x4x18x18xf32>
      tpu.vector_store %arg6[%c0_5, %c0_6, %c0_7, %c0_8], %6 {strides = array<i32>} : memref<1x4x18x18xf32, #tpu.memory_space<vmem>>, vector<1x4x18x18xf32>,
    } else {
    }
    %c1_i32_0 = arith.constant 1 : i32
    %3 = arith.cmpi sge, %arg1, %c1_i32_0 : i32
    %4 = arith.extui %3 : i1 to i32
    %c0_i32_1 = arith.constant 0 : i32
    %5 = arith.cmpi ne, %4, %c0_i32_1 : i32
    scf.if %5 {
      %c0 = arith.constant 0 : index
      %c0_2 = arith.constant 0 : index
      %c0_3 = arith.constant 0 : index
      %c0_4 = arith.constant 0 : index
      %6 = vector.load %arg2[%c0, %c0_2, %c0_3, %c0_4] : memref<1x4x8x8xf32, #tpu.memory_space<vmem>>, vector<1x4x8x8xf32>
      %7 = vector.shape_cast %6 : vector<1x4x8x8xf32> to vector<4x8x8xf32>
      %8 = vector.shape_cast %7 : vector<4x8x8xf32> to vector<32x8xf32>
      %c0_5 = arith.constant 0 : index
      %c0_6 = arith.constant 0 : index
      %9 = vector.load %arg5[%c0_5, %c0_6] : memref<8x18xf32, #tpu.memory_space<vmem>>, vector<8x18xf32>
      %cst = arith.constant dense<0.000000e+00> : vector<32x18xf32>
      %10 = tpu.matmul %8, %9, %cst {dimension_numbers = #tpu.dot_dimension_numbers<[1], [0], [0], [1], [0, 0, 1, 1], [], []>} : vector<32x8xf32>, vector<8x18xf32>, vector<32x18xf32> -> vector<32x18xf32>
      %11 = vector.shape_cast %10 : vector<32x18xf32> to vector<4x8x18xf32>
      %c0_7 = arith.constant 0 : index
      %c0_8 = arith.constant 0 : index
      %12 = vector.load %arg4[%c0_7, %c0_8] : memref<18x8xf32, #tpu.memory_space<vmem>>, vector<18x8xf32>
      %13 = vector.extract_strided_slice %11 {offsets = [0, 0, 0], sizes = [1, 8, 18], strides = [1, 1, 1]} : vector<4x8x18xf32> to vector<1x8x18xf32>
      %14 = vector.shape_cast %13 : vector<1x8x18xf32> to vector<8x18xf32>
      %cst_9 = arith.constant dense<0.000000e+00> : vector<18x18xf32>
      %15 = tpu.matmul %12, %14, %cst_9 {dimension_numbers = #tpu.dot_dimension_numbers<[1], [0], [0], [1], [0, 0, 1, 1], [], []>} : vector<18x8xf32>, vector<8x18xf32>, vector<18x18xf32> -> vector<18x18xf32>
      %c0_10 = arith.constant 0 : index
      %c0_11 = arith.constant 0 : index
      %c0_12 = arith.constant 0 : index
      %c0_13 = arith.constant 0 : index
      %16 = vector.load %arg6[%c0_10, %c0_11, %c0_12, %c0_13] : memref<1x4x18x18xf32, #tpu.memory_space<vmem>>, vector<1x1x18x18xf32>
      %17 = vector.shape_cast %16 : vector<1x1x18x18xf32> to vector<18x18xf32>
      %18 = vector.shape_cast %15 : vector<18x18xf32> to vector<1x1x18x18xf32>
      tpu.vector_store %arg6[%c0_10, %c0_11, %c0_12, %c0_13], %18 {strides = array<i32>} : memref<1x4x18x18xf32, #tpu.memory_space<vmem>>, vector<1x1x18x18xf32>,
      %19 = vector.extract_strided_slice %11 {offsets = [1, 0, 0], sizes = [1, 8, 18], strides = [1, 1, 1]} : vector<4x8x18xf32> to vector<1x8x18xf32>
      %20 = vector.shape_cast %19 : vector<1x8x18xf32> to vector<8x18xf32>
      %cst_14 = arith.constant dense<0.000000e+00> : vector<18x18xf32>
      %21 = tpu.matmul %12, %20, %cst_14 {dimension_numbers = #tpu.dot_dimension_numbers<[1], [0], [0], [1], [0, 0, 1, 1], [], []>} : vector<18x8xf32>, vector<8x18xf32>, vector<18x18xf32> -> vector<18x18xf32>
      %c0_15 = arith.constant 0 : index
      %c1 = arith.constant 1 : index
      %c0_16 = arith.constant 0 : index
      %c0_17 = arith.constant 0 : index
      %22 = vector.load %arg6[%c0_15, %c1, %c0_16, %c0_17] : memref<1x4x18x18xf32, #tpu.memory_space<vmem>>, vector<1x1x18x18xf32>
      %23 = vector.shape_cast %22 : vector<1x1x18x18xf32> to vector<18x18xf32>
      %24 = vector.shape_cast %21 : vector<18x18xf32> to vector<1x1x18x18xf32>
      tpu.vector_store %arg6[%c0_15, %c1, %c0_16, %c0_17], %24 {strides = array<i32>} : memref<1x4x18x18xf32, #tpu.memory_space<vmem>>, vector<1x1x18x18xf32>,
      %25 = vector.extract_strided_slice %11 {offsets = [2, 0, 0], sizes = [1, 8, 18], strides = [1, 1, 1]} : vector<4x8x18xf32> to vector<1x8x18xf32>
      %26 = vector.shape_cast %25 : vector<1x8x18xf32> to vector<8x18xf32>
      %cst_18 = arith.constant dense<0.000000e+00> : vector<18x18xf32>
      %27 = tpu.matmul %12, %26, %cst_18 {dimension_numbers = #tpu.dot_dimension_numbers<[1], [0], [0], [1], [0, 0, 1, 1], [], []>} : vector<18x8xf32>, vector<8x18xf32>, vector<18x18xf32> -> vector<18x18xf32>
      %c0_19 = arith.constant 0 : index
      %c2 = arith.constant 2 : index
      %c0_20 = arith.constant 0 : index
      %c0_21 = arith.constant 0 : index
      %28 = vector.load %arg6[%c0_19, %c2, %c0_20, %c0_21] : memref<1x4x18x18xf32, #tpu.memory_space<vmem>>, vector<1x1x18x18xf32>
      %29 = vector.shape_cast %28 : vector<1x1x18x18xf32> to vector<18x18xf32>
      %30 = vector.shape_cast %27 : vector<18x18xf32> to vector<1x1x18x18xf32>
      tpu.vector_store %arg6[%c0_19, %c2, %c0_20, %c0_21], %30 {strides = array<i32>} : memref<1x4x18x18xf32, #tpu.memory_space<vmem>>, vector<1x1x18x18xf32>,
      %31 = vector.extract_strided_slice %11 {offsets = [3, 0, 0], sizes = [1, 8, 18], strides = [1, 1, 1]} : vector<4x8x18xf32> to vector<1x8x18xf32>
      %32 = vector.shape_cast %31 : vector<1x8x18xf32> to vector<8x18xf32>
      %cst_22 = arith.constant dense<0.000000e+00> : vector<18x18xf32>
      %33 = tpu.matmul %12, %32, %cst_22 {dimension_numbers = #tpu.dot_dimension_numbers<[1], [0], [0], [1], [0, 0, 1, 1], [], []>} : vector<18x8xf32>, vector<8x18xf32>, vector<18x18xf32> -> vector<18x18xf32>
      %c0_23 = arith.constant 0 : index
      %c3 = arith.constant 3 : index
      %c0_24 = arith.constant 0 : index
      %c0_25 = arith.constant 0 : index
      %34 = vector.load %arg6[%c0_23, %c3, %c0_24, %c0_25] : memref<1x4x18x18xf32, #tpu.memory_space<vmem>>, vector<1x1x18x18xf32>
      %35 = vector.shape_cast %34 : vector<1x1x18x18xf32> to vector<18x18xf32>
      %36 = vector.shape_cast %33 : vector<18x18xf32> to vector<1x1x18x18xf32>
      tpu.vector_store %arg6[%c0_23, %c3, %c0_24, %c0_25], %36 {strides = array<i32>} : memref<1x4x18x18xf32, #tpu.memory_space<vmem>>, vector<1x1x18x18xf32>,
    } else {
    }
    return
  }
  func.func @transform_0(%arg0: i32, %arg1: i32) -> (i32, i32, i32, i32) {
    %c1_i32 = arith.constant 1 : i32
    %0 = arith.subi %arg1, %c1_i32 : i32
    %c0_i32 = arith.constant 0 : i32
    %1 = arith.maxsi %0, %c0_i32 : i32
    %c0_i32_0 = arith.constant 0 : i32
    %c0_i32_1 = arith.constant 0 : i32
    %c0_i32_2 = arith.constant 0 : i32
    return %arg0, %1, %c0_i32_0, %c0_i32_1 : i32, i32, i32, i32
  }
  func.func @transform_1(%arg0: i32, %arg1: i32) -> (i32, i32, i32, i32) {
    %c0_i32 = arith.constant 0 : i32
    %0 = arith.minsi %arg1, %c0_i32 : i32
    %c0_i32_0 = arith.constant 0 : i32
    %c0_i32_1 = arith.constant 0 : i32
    %c0_i32_2 = arith.constant 0 : i32
    return %arg0, %0, %c0_i32_0, %c0_i32_1 : i32, i32, i32, i32
  }
  func.func @transform_2(%arg0: i32, %arg1: i32) -> (i32, i32) {
    %c0_i32 = arith.constant 0 : i32
    %c0_i32_0 = arith.constant 0 : i32
    %c0_i32_1 = arith.constant 0 : i32
    return %c0_i32, %c0_i32_0 : i32, i32
  }
  func.func @transform_3(%arg0: i32, %arg1: i32) -> (i32, i32) {
    %c0_i32 = arith.constant 0 : i32
    %c0_i32_0 = arith.constant 0 : i32
    %c0_i32_1 = arith.constant 0 : i32
    return %c0_i32, %c0_i32_0 : i32, i32
  }
  func.func @transform_4(%arg0: i32, %arg1: i32) -> (i32, i32, i32, i32) {
    %c0_i32 = arith.constant 0 : i32
    %c0_i32_0 = arith.constant 0 : i32
    %c0_i32_1 = arith.constant 0 : i32
    return %arg0, %arg1, %c0_i32, %c0_i32_0 : i32, i32, i32, i32
  }
}

</mosaic_0001>

<bundles_post_ra>
// kernel: tpu_custom_call.1
= control target key start
LH: loop header
LB: loop body
LE: loop exit
PB: predicated region body
PF: predicated region fallthrough
CT: control target
= control target key end

     0   :  { %s1148_s15 = smov 0   ;;  %s1150_s16 = smov 0   ;;  %s1306_s0 = inlined_call_operand.vmem [shape: f32[2,4,8,8], index: 0, kind: input, shape index: {}]   ;;  %s1307_s1 = inlined_call_operand.vmem [shape: f32[2,4,18,18], index: 1, kind: input, shape index: {}]   ;;  %s1308_s2 = inlined_call_operand.vmem [shape: f32[18,8], index: 2, kind: input, shape index: {}]   ;;  %s1309_s3 = inlined_call_operand.vmem [shape: f32[8,18], index: 3, kind: input, shape index: {}]   ;;  %s1310_s4 = inlined_call_operand.vmem [shape: f32[2,8,18,18], index: 4, kind: output, shape index: {}]  }
   0x1   :  { %s1152_s17 = smov 0   ;;  %s1154_s18 = smov 0  }
   0x2   :  { %s1156_s19 = smov 0  }
   0x3 LB: > { %s23_s20 = sadd.s32 1, %s1111_s17  ;;  %s26_s21 = sadd.s32 1, %s1115_s18  ;;  %s1119_s19 = sphi %s1156_s19, %s14_s19   ;;  %s1115_s18 = sphi %s1154_s18, %s1316_s18   ;;  %s1111_s17 = sphi %s1152_s17, %s1315_s17   ;;  %s1107_s16 = sphi %s1150_s16, %s1314_s16   ;;  %s1103_s15 = sphi %s1148_s15, %s1313_s15  }
   0x4   : > { %p24_p0 = scmp.ge.s32.totalorder %s23_s20, 2  ;;  %p922_p1 = scmp.ge.s32.totalorder %s1119_s19, 1 }
   0x5   : > { %p221_p2 = scmp.lt.s32.totalorder %s1119_s19, 5 }
   0x6   : > { %s1318_s20 = smov (%p24_p0, %s23_s20), 0  ;;  %s1320_s21 = smov (!%p24_p0, %s26_s21), %s1115_s18 }
   0x7   : > { %p222_p3 = pnand %p922_p1, %p221_p2  ;;  %p28_p4 = scmp.ge.s32.totalorder %s1320_s21, 2 }
   0x8   : > { %s923_s22 = sadd.s32 (!%p222_p3), 4294967295, %s1103_s15  ;;  %p275_p5 = scmp.lt.s32.totalorder (!%p222_p3), %s1107_s16, 1 }
   0x9   : > { %s1322_s21 = smov (%p28_p4, %s1320_s21), 0  ;;  %225 = sbr.rel (%p222_p3) target bundleno = 490 (0x1ea), region = 36 }
   0xa   : > { %1311 = sst [smem:[#allocation2_spill]] %s1322_s21  ;;  %p272_p6 = scmp.gt.s32.totalorder (!%p222_p3), %s923_s22, 0 }
   0xb   : > { %p287_p7 = scmp.lt.s32.totalorder (!%p222_p3), %s1103_s15, 0  ;;  %s929_s25 = sshll.u32 (!%p222_p3), %s1103_s15, 2 }
   0xc   : > { %p305_p9 = scmp.lt.s32.totalorder (!%p222_p3), %s929_s25, 7  ;;  %p931_p11 = scmp.ge.s32.totalorder (!%p222_p3), %s1103_s15, 1 }
  0x10   : > { %s1324_s16 = smov (!%p275_p5, %s1107_s16), 1  ;;  %s1326_s22 = smov (!%p272_p6, %s923_s22), 0 }
  0x11   : > { %s924_s23 = sshll.u32 %s1326_s22, 2  ;;  %s925_s24 = sshll.u32 %s1324_s16, 2  ;;  %vm329_vm0 = vcmask (!%p931_p11), 146432   ;;  %vm332_vm1 = vcmask (!%p931_p11), 140288  }
  0x12   : > { %p277_p8 = scmp.lt.s32.totalorder %s924_s23, 3  ;;  %s1036_s30 = smul.u32 12, %s1324_s16 }
  0x13   : > { %s288_s26 = scalar_select %p287_p7, %s1103_s15, 0 }
  0x14   : > { %s1328_s23 = smov (!%p277_p8, %s924_s23), 3  ;;  %s1038_s8 = smul.u32 24, %s1324_s16 }
  0x15   : > { %s927_s27 = sshll.u32 %s288_s26, 2  ;;  %s280_s28 = sadd.s32 %s925_s24, %s1328_s23 }
  0x16   : > { %p292_p10 = scmp.lt.s32.totalorder %s927_s27, 3  ;;  %s926_s29 = sshll.u32 %s280_s28, 3 }
  0x17   : > { %s1187_s7 = scalar_lea.vmem %s1306_s0, %s926_s29  ;;  %s1332_s25 = smov (!%p305_p9, %s929_s25), 7 }
  0x18   : > { %s1330_s27 = smov (!%p292_p10, %s927_s27), 3  ;;  %s1037_s10 = smul.u32 3, %s1332_s25 }
  0x19   : > { %s1035_s9 = smul.u32 3, %s1330_s27 }
  0x1a   : > { %s309_s13 = sadd.s32 %s1038_s8, %s1037_s10  ;;  %316 = sbr.rel (%p931_p11) target bundleno = 38 (0x26), region = 40 }
  0x1b   : > { %s296_s11 = sadd.s32 %s1036_s30, %s1035_s9  ;;  %s930_s24 = sshll.u32 %s309_s13, 3 }
  0x1c   : > { %s928_s12 = sshll.u32 %s296_s11, 3  ;;  %s1195_s21 = scalar_lea.vmem %s1310_s4, %s930_s24 }
  0x1d   : > { %s298_s23 = scalar_lea.vmem %s1307_s1, %s928_s12 }
  0x1e   : > { %v317_v0 = vld [vmem:[%s298_s23] sm:$0xff] (!%p931_p11)  ;;  %v318_v1 = vld [vmem:[%s298_s23 + $0x8] sm:$0xff] (!%p931_p11)  ;;  %v319_v2 = vld [vmem:[%s298_s23 + $0x10] sm:$0x3] (!%p931_p11) }
  0x1f   : > { %330 = vst.msk [vmem:[%s1195_s21] sm:$0xff] (!%p931_p11), %vm329_vm0, %v317_v0  ;;  %331 = vst.msk [vmem:[%s1195_s21 + $0x8] sm:$0xff] (!%p931_p11), %vm329_vm0, %v318_v1  ;;  %v320_v3 = vld [vmem:[%s298_s23 + $0x18] sm:$0xff] (!%p931_p11)  ;;  %v321_v4 = vld [vmem:[%s298_s23 + $0x20] sm:$0xff] (!%p931_p11) }
  0x20   : > { %333 = vst.msk [vmem:[%s1195_s21 + $0x10] sm:$0x3] (!%p931_p11), %vm332_vm1, %v319_v2  ;;  %v322_v5 = vld [vmem:[%s298_s23 + $0x28] sm:$0x3] (!%p931_p11)  ;;  %v323_v6 = vld [vmem:[%s298_s23 + $0x30] sm:$0xff] (!%p931_p11)  ;;  %v324_v7 = vld [vmem:[%s298_s23 + $0x38] sm:$0xff] (!%p931_p11) }
  0x21   : > { %334 = vst.msk [vmem:[%s1195_s21 + $0x18] sm:$0xff] %vm329_vm0, %v320_v3  ;;  %335 = vst.msk [vmem:[%s1195_s21 + $0x20] sm:$0xff] %vm329_vm0, %v321_v4  ;;  %v325_v8 = vld [vmem:[%s298_s23 + $0x40] sm:$0x3]  ;;  %v326_v9 = vld [vmem:[%s298_s23 + $0x48] sm:$0xff] }
  0x22   : > { %336 = vst.msk [vmem:[%s1195_s21 + $0x28] sm:$0x3] %vm332_vm1, %v322_v5  ;;  %339 = vst.msk [vmem:[%s1195_s21 + $0x40] sm:$0x3] %vm332_vm1, %v325_v8  ;;  %v327_v10 = vld [vmem:[%s298_s23 + $0x50] sm:$0xff] }
  0x23   : > { %337 = vst.msk [vmem:[%s1195_s21 + $0x30] sm:$0xff] %vm329_vm0, %v323_v6  ;;  %338 = vst.msk [vmem:[%s1195_s21 + $0x38] sm:$0xff] %vm329_vm0, %v324_v7  ;;  %v328_v11 = vld [vmem:[%s298_s23 + $0x58] sm:$0x3] }
  0x24   : > { %340 = vst.msk [vmem:[%s1195_s21 + $0x48] sm:$0xff] %vm329_vm0, %v326_v9  ;;  %341 = vst.msk [vmem:[%s1195_s21 + $0x50] sm:$0xff] %vm329_vm0, %v327_v10 }
  0x25   : > { %342 = vst.msk [vmem:[%s1195_s21 + $0x58] sm:$0x3] %vm332_vm1, %v328_v11 }
  0x26 PF: > { %p932_p12 = scmp.lt.s32.totalorder %s1103_s15, 1 }
  0x27   : > { %v351_v12 = vld [vmem:[%s1309_s3] sm:$0xff] (!%p932_p12)  ;;  %vm352_vm2 = vcmask (!%p932_p12), 64512   ;;  %v348_v14 = vld [vmem:[%s1187_s7 + $0x8] sm:$0xff] (!%p932_p12)  ;;  %v349_v15 = vld [vmem:[%s1187_s7 + $0x10] sm:$0xff] (!%p932_p12)  ;;  %v1121_v17 = vmov (!%p932_p12), 0.0   ;;  %vm1122_vm3 = vmmov (!%p932_p12), 0  }
  0x28   : > { %346 = sbr.rel (%p932_p12) target bundleno = 490 (0x1ea), region = 44  ;;  %v347_v13 = vld [vmem:[%s1187_s7] sm:$0xff] (!%p932_p12)  ;;  %981 = vmatprep.subr.mxu0 (!%p932_p12), %v351_v12  ;;  %1033 = vmatprep.subr.mxu1 (!%p932_p12), %v351_v12  ;;  %v350_v16 = vld [vmem:[%s1187_s7 + $0x18] sm:$0xff] (!%p932_p12)  ;;  %v451_v23 = vld [vmem:[%s1308_s2 + $0x8] sm:$0xff] (!%p932_p12)  ;;  %vm542_vm4 = vcmask (!%p932_p12), 146432   ;;  %vm545_vm5 = vcmask (!%p932_p12), 140288  }
  0x29   : > { %983 = vmatprep.mubr.msk.f32.mxu0 (!%p932_p12), %vm352_vm2, %v347_v13  ;;  %982 = vmatpush3.msra.mxu0 (!%p932_p12), %v351_v12  ;;  %v450_v19 = vld [vmem:[%s1308_s2] sm:$0xff] (!%p932_p12)  ;;  %v452_v24 = vld [vmem:[%s1308_s2 + $0x10] sm:$0x3] (!%p932_p12) }
  0x2a   : > { %984 = vmatmul.mubr.msk.f32.vlgmr.msra.gmra.mrb[0].mxu0 (!%p932_p12), %vm352_vm2, %v348_v14  ;;  %1034 = vmatpush3.msra.mxu1 (!%p932_p12), %v351_v12 }
  0x2b   : > { %986 = vmatprep.mubr.msk.f32.mxu1 (!%p932_p12), %vm352_vm2, %v349_v15  ;;  %1000 = vmatprep.subr.mxu0 (!%p932_p12), %v1121_v17 }
  0x2c   : > { %987 = vmatmul.mubr.msk.f32.vlgmr.msra.gmra.mrb[0].mxu1 (!%p932_p12), %vm352_vm2, %v350_v16  ;;  %989 = vmatprep.subr.mxu1 (!%p932_p12), %v1121_v17 }
  0x2d   : > { %991 = vmatprep.mubr.msk.f32.mxu1 (!%p932_p12), %vm1122_vm3, %v1121_v17  ;;  %1002 = vmatprep.mubr.msk.f32.mxu0 (!%p932_p12), %vm1122_vm3, %v1121_v17 }
  0xfd   : > { %v985_v18 = vpop.f32.mrb[0].mxu0 }
  0xfe   : > { %v431_v20 = vpop.f32.mrb[1].mxu0  ;;  %1001 = vmatpush3.msra.mxu0 %v985_v18 }
  0xff   : > { %990 = vmatpush3.msra.mxu1 %v431_v20  ;;  %v988_v21 = vpop.f32.mrb[0].mxu1  ;;  %1022 = vmatprep.subr.mxu0 %v1121_v17 }
 0x100   : > { %v441_v22 = vpop.f32.mrb[1].mxu1  ;;  %1011 = vmatprep.subr.mxu1 %v1121_v17  ;;  %992 = vmatmul.mubr.msk.f32.vlgmr.msra.gmra.mrb[2].mxu1 %vm352_vm2, %v450_v19 }
 0x101   : > { %1003 = vmatmul.mubr.msk.f32.vlgmr.msra.gmra.mrb[2].mxu0 %vm352_vm2, %v450_v19  ;;  %1012 = vmatpush3.msra.mxu1 %v441_v22 }
 0x102   : > { %1023 = vmatpush3.msra.mxu0 %v988_v21  ;;  %994 = vmatprep.mubr.msk.f32.mxu1 %vm1122_vm3, %v1121_v17 }
 0x103   : > { %1005 = vmatprep.mubr.msk.f32.mxu0 %vm1122_vm3, %v1121_v17 }
 0x104   : > { %995 = vmatmul.mubr.msk.f32.gmra.mrb[4].mxu1 %vm352_vm2, %v451_v23 }
 0x105   : > { %1006 = vmatmul.mubr.msk.f32.gmra.mrb[4].mxu0 %vm352_vm2, %v451_v23  ;;  %997 = vmatprep.mubr.msk.f32.mxu1 %vm1122_vm3, %v1121_v17 }
 0x106   : > { %1008 = vmatprep.mubr.msk.f32.mxu0 %vm1122_vm3, %v1121_v17 }
 0x108   : > { %998 = vmatmul.mubr.msk.f32.gmra.mrb[6].mxu1 %vm352_vm2, %v452_v24 }
 0x109   : > { %1009 = vmatmul.mubr.msk.f32.gmra.mrb[6].mxu0 %vm352_vm2, %v452_v24  ;;  %1013 = vmatprep.mubr.msk.f32.mxu1 %vm1122_vm3, %v1121_v17 }
 0x10a   : > { %1024 = vmatprep.mubr.msk.f32.mxu0 %vm1122_vm3, %v1121_v17 }
 0x10c   : > { %1014 = vmatmul.mubr.msk.f32.vlgmr.msra.gmra.mrb[8].mxu1 %vm352_vm2, %v450_v19 }
 0x10d   : > { %1025 = vmatmul.mubr.msk.f32.vlgmr.msra.gmra.mrb[8].mxu0 %vm352_vm2, %v450_v19  ;;  %1016 = vmatprep.mubr.msk.f32.mxu1 %vm1122_vm3, %v1121_v17 }
 0x10e   : > { %1027 = vmatprep.mubr.msk.f32.mxu0 %vm1122_vm3, %v1121_v17 }
 0x110   : > { %1017 = vmatmul.mubr.msk.f32.gmra.mrb[10].mxu1 %vm352_vm2, %v451_v23 }
 0x111   : > { %1028 = vmatmul.mubr.msk.f32.gmra.mrb[10].mxu0 %vm352_vm2, %v451_v23  ;;  %1019 = vmatprep.mubr.msk.f32.mxu1 %vm1122_vm3, %v1121_v17 }
 0x112   : > { %1030 = vmatprep.mubr.msk.f32.mxu0 %vm1122_vm3, %v1121_v17 }
 0x114   : > { %1020 = vmatmul.mubr.msk.f32.gmra.mrb[12].mxu1 %vm352_vm2, %v452_v24 }
 0x115   : > { %1031 = vmatmul.mubr.msk.f32.gmra.mrb[12].mxu0 %vm352_vm2, %v452_v24 }
 0x1d3   : > { %v528_v25 = vpop.f32.mrb[2].mxu1 }
 0x1d4   : > { %543 = vst.msk [vmem:[%s1195_s21] sm:$0xff] %vm542_vm4, %v528_v25  ;;  %v613_v26 = vpop.f32.mrb[2].mxu0  ;;  %v993_v27 = vpop.f32.mrb[3].mxu1 }
 0x1d5   : > { %943 = vst.msk [vmem:[%s1195_s21 + $0x18] sm:$0xff] %vm542_vm4, %v613_v26  ;;  %v1004_v28 = vpop.f32.mrb[3].mxu0 }
 0x1d7   : > { %v533_v29 = vpop.f32.mrb[4].mxu1 }
 0x1d8   : > { %544 = vst.msk [vmem:[%s1195_s21 + $0x8] sm:$0xff] %vm542_vm4, %v533_v29  ;;  %v618_v30 = vpop.f32.mrb[4].mxu0  ;;  %v996_v31 = vpop.f32.mrb[5].mxu1 }
 0x1d9   : > { %944 = vst.msk [vmem:[%s1195_s21 + $0x20] sm:$0xff] %vm542_vm4, %v618_v30  ;;  %v1007_v32 = vpop.f32.mrb[5].mxu0 }
 0x1db   : > { %v538_v33 = vpop.f32.mrb[6].mxu1 }
 0x1dc   : > { %546 = vst.msk [vmem:[%s1195_s21 + $0x10] sm:$0x3] %vm545_vm5, %v538_v33  ;;  %v623_v34 = vpop.f32.mrb[6].mxu0  ;;  %v999_v35 = vpop.f32.mrb[7].mxu1 }
 0x1dd   : > { %945 = vst.msk [vmem:[%s1195_s21 + $0x28] sm:$0x3] %vm545_vm5, %v623_v34  ;;  %v1010_v36 = vpop.f32.mrb[7].mxu0 }
 0x1df   : > { %v697_v37 = vpop.f32.mrb[8].mxu1 }
 0x1e0   : > { %949 = vst.msk [vmem:[%s1195_s21 + $0x30] sm:$0xff] %vm542_vm4, %v697_v37  ;;  %v781_v38 = vpop.f32.mrb[8].mxu0  ;;  %v1015_v39 = vpop.f32.mrb[9].mxu1 }
 0x1e1   : > { %955 = vst.msk [vmem:[%s1195_s21 + $0x48] sm:$0xff] %vm542_vm4, %v781_v38  ;;  %v1026_v40 = vpop.f32.mrb[9].mxu0 }
 0x1e3   : > { %v702_v41 = vpop.f32.mrb[10].mxu1 }
 0x1e4   : > { %950 = vst.msk [vmem:[%s1195_s21 + $0x38] sm:$0xff] %vm542_vm4, %v702_v41  ;;  %v786_v42 = vpop.f32.mrb[10].mxu0  ;;  %v1018_v43 = vpop.f32.mrb[11].mxu1 }
 0x1e5   : > { %956 = vst.msk [vmem:[%s1195_s21 + $0x50] sm:$0xff] %vm542_vm4, %v786_v42  ;;  %v1029_v44 = vpop.f32.mrb[11].mxu0 }
 0x1e7   : > { %v707_v45 = vpop.f32.mrb[12].mxu1 }
 0x1e8   : > { %951 = vst.msk [vmem:[%s1195_s21 + $0x40] sm:$0x3] %vm545_vm5, %v707_v45  ;;  %v791_v46 = vpop.f32.mrb[12].mxu0  ;;  %v1021_v47 = vpop.f32.mrb[13].mxu1 }
 0x1e9   : > { %957 = vst.msk [vmem:[%s1195_s21 + $0x58] sm:$0x3] %vm545_vm5, %v791_v46  ;;  %v1032_v48 = vpop.f32.mrb[13].mxu0 }
 0x1ea PF: > { %s14_s19 = sadd.s32 1, %s1119_s19   ;;  %s1312_s7 = sld [smem:[#allocation2_spill]] }
 0x1eb   : > { %p11_p13 = scmp.ge.s32.totalorder %s14_s19, 6   ;;  %s1313_s15 = smov %s1111_s17 }
 0x1ec   : > { %s1314_s16 = smov %s1115_s18  ;;  %s1315_s17 = smov %s1318_s20 }
 0x1ed   :  { %13 = sbr.rel (!%p11_p13) target bundleno = 3 (0x3), region = 80 }
 0x1f0   : > { %s1316_s18 = smov %s1312_s7 }

</bundles_post_ra>
